<compile_context>
chip_gen: v7x
topology: tpu7x:2x2x1
jax: 0.10.0
libtpu: 0.0.40
codegen_flags: <defaults>
</compile_context>

<pallas_src>
import functools

import numpy as np
import jax
import jax.numpy as jnp
from jax.experimental import pallas as pl
from jax.experimental.pallas import tpu as pltpu

_TILE_TARGET_CAP = 4 * 1024 * 1024       # per-tile x footprint cap in the tiled path


@functools.lru_cache(maxsize=None)
def _tpu_budget():
    """(usable VMEM bytes, tensorcores per chip). Conservative fallbacks if query fails."""
    phys = 64 * 1024 * 1024              # safe default (v7x-sized) if the query fails
    cores = 1
    try:
        info = pltpu.get_tpu_info()
        phys = int(getattr(info, "vmem_capacity_bytes", phys) or phys)
        for name in ("num_cores", "core_count", "tensorcores_per_chip", "num_tensorcores"):
            v = getattr(info, name, None)
            if v:
                cores = int(v)
                break
    except Exception:
        pass
    budget = (phys * 3) // 4             # leave headroom below physical VMEM
    return budget, cores


# ---------------------------------------------------------------------------
# Shared FC epilogue: both pooled vectors through one (C,2) matmul pair
# ---------------------------------------------------------------------------
def _attention_from_pooled(avg, mx, w1_ref, w2_ref):
    pooled = jnp.concatenate([avg, mx], axis=-1)                  # (C, 2), f32
    w1 = w1_ref[...].astype(jnp.float32)
    w2 = w2_ref[...].astype(jnp.float32)
    h = jnp.maximum(jnp.dot(w1, pooled, preferred_element_type=jnp.float32), 0.0)
    y = jnp.dot(w2, h, preferred_element_type=jnp.float32)        # (C, 2)
    return jax.nn.sigmoid(y[:, 0:1] + y[:, 1:2])                  # (C, 1)


# ---------------------------------------------------------------------------
# Fused single-pass SA kernel (one batch element per grid step)
# ---------------------------------------------------------------------------
def _sa_fused_kernel(x_ref, w1_ref, w2_ref, o_ref):
    # x_ref/o_ref: (1, C, HW) in x's native dtype; w1_ref: (Cr, C); w2_ref: (C, Cr)
    x = x_ref[0]                                                  # (C, HW), native dtype
    hw = x.shape[-1]
    xf = x.astype(jnp.float32)
    avg = jnp.sum(xf, axis=-1, keepdims=True) * (1.0 / hw)        # AdaptiveAvgPool2d(1)
    mx = jnp.max(xf, axis=-1, keepdims=True)                      # AdaptiveMaxPool2d(1)
    attn = _attention_from_pooled(avg, mx, w1_ref, w2_ref)        # (C, 1) f32
    # scale in native dtype (matches PyTorch low-precision semantics, avoids a
    # full-block f32 temporary for the output path)
    o_ref[0] = x * attn.astype(x_ref.dtype)


# ---------------------------------------------------------------------------
# Tiled path, kernel 1: per-channel sum/max over H*W tiles -> attention vector
# ---------------------------------------------------------------------------
def _sa_stats_kernel(x_ref, w1_ref, w2_ref, attn_ref, sum_sc, max_sc,
                     *, hw_total, tile, ragged):
    t = pl.program_id(1)
    last = pl.num_programs(1) - 1

    @pl.when(t == 0)
    def _():
        sum_sc[...] = jnp.zeros_like(sum_sc)
        max_sc[...] = jnp.full_like(max_sc, -jnp.inf)

    x = x_ref[0].astype(jnp.float32)                              # (C, tile)

    if ragged:
        # steady-state tiles: unmasked reduction (keeps v7x DMA-bound)
        @pl.when(t != last)
        def _():
            sum_sc[...] += jnp.sum(x, axis=-1, keepdims=True)
            max_sc[...] = jnp.maximum(max_sc[...], jnp.max(x, axis=-1, keepdims=True))

        # only the ragged last tile pays for the iota/compare/select mask work
        @pl.when(t == last)
        def _():
            col = jax.lax.broadcasted_iota(jnp.int32, x.shape, dimension=1)
            valid = col < (hw_total - t * tile)
            sum_sc[...] += jnp.sum(jnp.where(valid, x, 0.0), axis=-1, keepdims=True)
            max_sc[...] = jnp.maximum(
                max_sc[...],
                jnp.max(jnp.where(valid, x, -jnp.inf), axis=-1, keepdims=True))
    else:
        sum_sc[...] += jnp.sum(x, axis=-1, keepdims=True)
        max_sc[...] = jnp.maximum(max_sc[...], jnp.max(x, axis=-1, keepdims=True))

    @pl.when(t == last)
    def _():
        avg = sum_sc[...] * (1.0 / hw_total)
        attn_ref[0] = _attention_from_pooled(avg, max_sc[...], w1_ref, w2_ref)


# ---------------------------------------------------------------------------
# Tiled path, kernel 2: lane-dense broadcast scale (native dtype in/out)
# ---------------------------------------------------------------------------
def _sa_scale_kernel(x_ref, attn_ref, o_ref):
    o_ref[0] = x_ref[0] * attn_ref[0].astype(x_ref.dtype)        # (C, tile) * (C, 1)


# ---------------------------------------------------------------------------
# Public wrapper (jit'ed): x is NCHW, w1 = fc[0].weight (Cr, C), w2 = fc[2].weight (C, Cr)
# ---------------------------------------------------------------------------
@functools.partial(jax.jit, static_argnames=("spatial_tile",))
def sa_forward(x, w1, w2, spatial_tile=None):
    N, C, H, W = x.shape
    HW = H * W
    Cr = w1.shape[0]
    xr = x.reshape(N, C, HW)                                      # no dtype cast: keep native
    itemsize = xr.dtype.itemsize

    vmem_budget, n_cores = _tpu_budget()
    weight_bytes = (w1.size * w1.dtype.itemsize + w2.size * w2.dtype.itemsize)
    avail = vmem_budget - 2 * weight_bytes - (1 << 20)            # weights double-buffered + slack
    # fused block VMEM: input + output double-buffered (4 * native bytes) plus one
    # f32 working set for the pooled reductions (4 bytes/elem) => budget-driven cap
    fused_max_bytes = max(0, (avail * itemsize) // (4 * itemsize + 4))
    block_bytes = C * HW * itemsize

    fused = spatial_tile is None and block_bytes <= fused_max_bytes
    # Megacore occupancy guard: grid=(N,) leaves a TensorCore idle when N == 1 on
    # multi-core chips (v7x); for big single images prefer the tiled path whose
    # scale kernel runs both grid axes "parallel".  Inert when core count unknown.
    if fused and N == 1 and n_cores > 1 and block_bytes > (4 << 20):
        fused = False

    if fused:
        out = pl.pallas_call(
            _sa_fused_kernel,
            out_shape=jax.ShapeDtypeStruct((N, C, HW), xr.dtype),
            grid=(N,),
            in_specs=[
                pl.BlockSpec((1, C, HW), lambda n: (n, 0, 0)),
                pl.BlockSpec((Cr, C), lambda n: (0, 0)),
                pl.BlockSpec((C, Cr), lambda n: (0, 0)),
            ],
            out_specs=pl.BlockSpec((1, C, HW), lambda n: (n, 0, 0)),
            compiler_params=pltpu.CompilerParams(
                dimension_semantics=("parallel",),
                vmem_limit_bytes=vmem_budget),
        )(xr, w1, w2)
        return out.reshape(N, C, H, W)

    # ---- spatially tiled path (very large images / forced spatial_tile) ----
    if spatial_tile is None:
        tile_target = min(_TILE_TARGET_CAP, max(1 << 20, vmem_budget // 12))
        spatial_tile = max(128, (tile_target // (C * itemsize)) // 128 * 128)
    tile = max(128, -(-int(spatial_tile) // 128) * 128)           # round up to a lane multiple
    n_t = -(-HW // tile)                                          # cdiv
    ragged = (HW % tile) != 0                                     # only then mask the last tile

    attn = pl.pallas_call(
        functools.partial(_sa_stats_kernel, hw_total=HW, tile=tile, ragged=ragged),
        out_shape=jax.ShapeDtypeStruct((N, C, 1), jnp.float32),
        grid=(N, n_t),
        in_specs=[
            pl.BlockSpec((1, C, tile), lambda n, t: (n, 0, t)),
            pl.BlockSpec((Cr, C), lambda n, t: (0, 0)),
            pl.BlockSpec((C, Cr), lambda n, t: (0, 0)),
        ],
        out_specs=pl.BlockSpec((1, C, 1), lambda n, t: (n, 0, 0)),
        scratch_shapes=[pltpu.VMEM((C, 1), jnp.float32),
                        pltpu.VMEM((C, 1), jnp.float32)],
        compiler_params=pltpu.CompilerParams(
            dimension_semantics=("parallel", "arbitrary"),
            vmem_limit_bytes=vmem_budget),
    )(xr, w1, w2)

    out = pl.pallas_call(
        _sa_scale_kernel,
        out_shape=jax.ShapeDtypeStruct((N, C, HW), xr.dtype),
        grid=(N, n_t),
        in_specs=[
            pl.BlockSpec((1, C, tile), lambda n, t: (n, 0, t)),
            pl.BlockSpec((1, C, 1), lambda n, t: (n, 0, 0)),
        ],
        out_specs=pl.BlockSpec((1, C, tile), lambda n, t: (n, 0, t)),
        compiler_params=pltpu.CompilerParams(
            dimension_semantics=("parallel", "parallel"),
            vmem_limit_bytes=vmem_budget),
    )(xr, attn)
    return out.reshape(N, C, H, W)


# ---------------------------------------------------------------------------
# Pure-JAX reference (mirrors the PyTorch SA/CA forward)
# ---------------------------------------------------------------------------
def sa_reference(x, w1, w2):
    xf = x.astype(jnp.float32)
    avg = jnp.mean(xf, axis=(2, 3))                               # (N, C)
    mx = jnp.max(xf, axis=(2, 3))                                 # (N, C)

    def fc(v):
        return jax.nn.relu(v @ w1.astype(jnp.float32).T) @ w2.astype(jnp.float32).T

    attn = jax.nn.sigmoid(fc(avg) + fc(mx))                       # (N, C)
    return xf * attn[:, :, None, None]


if __name__ == "__main__":
    N, C, H, W = 2, 64, 16, 16
    ratio = 16
    Cr = C // ratio

    key = jax.random.PRNGKey(0)
    kx, kw1, kw2 = jax.random.split(key, 3)
    x = jax.random.normal(kx, (N, C, H, W), jnp.float32)
    # PyTorch Conv2d(k=1, bias=False) default init: U(-1/sqrt(fan_in), 1/sqrt(fan_in))
    b1 = 1.0 / np.sqrt(C)
    b2 = 1.0 / np.sqrt(Cr)
    w1 = jax.random.uniform(kw1, (Cr, C), jnp.float32, -b1, b1)   # fc[0].weight squeezed
    w2 = jax.random.uniform(kw2, (C, Cr), jnp.float32, -b2, b2)   # fc[2].weight squeezed

    ref = np.asarray(jax.block_until_ready(sa_reference(x, w1, w2)))

    # fused single-pass path (default)
    out_fused = jax.block_until_ready(sa_forward(x, w1, w2))
    assert out_fused.shape == (N, C, H, W), out_fused.shape
    assert out_fused.dtype == x.dtype, out_fused.dtype
    np.testing.assert_allclose(np.asarray(out_fused), ref, rtol=1e-4, atol=1e-4)

    # spatially tiled two-kernel path, forced (non-ragged: HW % tile == 0)
    out_tiled = jax.block_until_ready(sa_forward(x, w1, w2, spatial_tile=128))
    np.testing.assert_allclose(np.asarray(out_tiled), ref, rtol=1e-4, atol=1e-4)

    # tiled path with a ragged last tile (exercises the last-tile mask)
    Hr = Wr = 12                                                  # HW = 144, tile = 128
    xr_small = jax.random.normal(jax.random.PRNGKey(1), (N, C, Hr, Wr), jnp.float32)
    ref_r = np.asarray(jax.block_until_ready(sa_reference(xr_small, w1, w2)))
    out_r = jax.block_until_ready(sa_forward(xr_small, w1, w2, spatial_tile=128))
    np.testing.assert_allclose(np.asarray(out_r), ref_r, rtol=1e-4, atol=1e-4)

    # native low-precision input: no wrapper-level upcast, output stays bf16
    x_bf = x.astype(jnp.bfloat16)
    ref_bf = np.asarray(jax.block_until_ready(sa_reference(x_bf, w1, w2)))
    out_bf = jax.block_until_ready(sa_forward(x_bf, w1, w2))
    assert out_bf.dtype == jnp.bfloat16, out_bf.dtype
    np.testing.assert_allclose(np.asarray(out_bf.astype(jnp.float32)), ref_bf,
                               rtol=5e-2, atol=5e-2)

    print("KERNEL_OK")
</pallas_src>

<mosaic_0001>
module attributes {stable_mosaic.version = 11 : i64} {
  func.func @_sa_fused_kernel(%arg0: i32, %arg1: memref<1x64x256xf32, #tpu.memory_space<vmem>>, %arg2: memref<4x64xf32, #tpu.memory_space<vmem>>, %arg3: memref<64x4xf32, #tpu.memory_space<vmem>>, %arg4: memref<1x64x256xf32, #tpu.memory_space<vmem>>) attributes {dimension_semantics = [#tpu.dimension_semantics<parallel>], iteration_bounds = array<i64: 2>, scalar_prefetch = 0 : i64, scratch_operands = 0 : i64, tpu.core_type = #tpu.core_type<tc>, window_params = [{transform_indices = @transform_0, window_bounds = array<i64: 1, 64, 256>}, {pipeline_mode = #tpu.pipeline_mode<synchronous>, transform_indices = @transform_1, window_bounds = array<i64: 4, 64>}, {pipeline_mode = #tpu.pipeline_mode<synchronous>, transform_indices = @transform_2, window_bounds = array<i64: 64, 4>}, {transform_indices = @transform_3, window_bounds = array<i64: 1, 64, 256>}]} {
    %c0 = arith.constant 0 : index
    %c0_0 = arith.constant 0 : index
    %c0_1 = arith.constant 0 : index
    %0 = vector.load %arg1[%c0, %c0_0, %c0_1] : memref<1x64x256xf32, #tpu.memory_space<vmem>>, vector<1x64x256xf32>
    %1 = vector.shape_cast %0 : vector<1x64x256xf32> to vector<64x256xf32>
    %cst = arith.constant dense<0.000000e+00> : vector<64xf32>
    %2 = vector.multi_reduction <add>, %1, %cst [1] : vector<64x256xf32> to vector<64xf32>
    %3 = vector.shape_cast %2 : vector<64xf32> to vector<64x1xf32>
    %cst_2 = arith.constant 3.906250e-03 : f32
    %4 = vector.broadcast %cst_2 : f32 to vector<64x1xf32>
    %5 = arith.mulf %3, %4 : vector<64x1xf32>
    %cst_3 = arith.constant dense<0xFF800000> : vector<64xf32>
    %6 = vector.multi_reduction <maximumf>, %1, %cst_3 [1] : vector<64x256xf32> to vector<64xf32>
    %7 = vector.shape_cast %6 : vector<64xf32> to vector<64x1xf32>
    %8 = tpu.concatenate %5, %7 in 1 : vector<64x1xf32>, vector<64x1xf32> -> vector<64x2xf32>
    %c0_4 = arith.constant 0 : index
    %c0_5 = arith.constant 0 : index
    %9 = vector.load %arg2[%c0_4, %c0_5] : memref<4x64xf32, #tpu.memory_space<vmem>>, vector<4x64xf32>
    %c0_6 = arith.constant 0 : index
    %c0_7 = arith.constant 0 : index
    %10 = vector.load %arg3[%c0_6, %c0_7] : memref<64x4xf32, #tpu.memory_space<vmem>>, vector<64x4xf32>
    %cst_8 = arith.constant dense<0.000000e+00> : vector<4x2xf32>
    %11 = tpu.matmul %9, %8, %cst_8 {dimension_numbers = #tpu.dot_dimension_numbers<[1], [0], [0], [1], [0, 0, 1, 1], [], []>} : vector<4x64xf32>, vector<64x2xf32>, vector<4x2xf32> -> vector<4x2xf32>
    %cst_9 = arith.constant 0.000000e+00 : f32
    %12 = vector.broadcast %cst_9 : f32 to vector<4x2xf32>
    %13 = arith.maximumf %11, %12 : vector<4x2xf32>
    %cst_10 = arith.constant dense<0.000000e+00> : vector<64x2xf32>
    %14 = tpu.matmul %10, %13, %cst_10 {dimension_numbers = #tpu.dot_dimension_numbers<[1], [0], [0], [1], [0, 0, 1, 1], [], []>} : vector<64x4xf32>, vector<4x2xf32>, vector<64x2xf32> -> vector<64x2xf32>
    %15 = vector.extract_strided_slice %14 {offsets = [0, 0], sizes = [64, 1], strides = [1, 1]} : vector<64x2xf32> to vector<64x1xf32>
    %16 = vector.extract_strided_slice %14 {offsets = [0, 1], sizes = [64, 1], strides = [1, 1]} : vector<64x2xf32> to vector<64x1xf32>
    %17 = arith.addf %15, %16 : vector<64x1xf32>
    %18 = arith.negf %17 : vector<64x1xf32>
    %19 = math.exp %18 : vector<64x1xf32>
    %cst_11 = arith.constant 1.000000e+00 : f32
    %20 = vector.broadcast %cst_11 : f32 to vector<64x1xf32>
    %21 = arith.addf %20, %19 : vector<64x1xf32>
    %22 = arith.divf %20, %21 : vector<64x1xf32>
    %23 = vector.broadcast %22 : vector<64x1xf32> to vector<64x256xf32>
    %24 = arith.mulf %1, %23 : vector<64x256xf32>
    %c0_12 = arith.constant 0 : index
    %c0_13 = arith.constant 0 : index
    %c0_14 = arith.constant 0 : index
    %25 = vector.load %arg4[%c0_12, %c0_13, %c0_14] : memref<1x64x256xf32, #tpu.memory_space<vmem>>, vector<1x64x256xf32>
    %26 = vector.shape_cast %25 : vector<1x64x256xf32> to vector<64x256xf32>
    %27 = vector.shape_cast %24 : vector<64x256xf32> to vector<1x64x256xf32>
    tpu.vector_store %arg4[%c0_12, %c0_13, %c0_14], %27 {strides = array<i32>} : memref<1x64x256xf32, #tpu.memory_space<vmem>>, vector<1x64x256xf32>,
    return
  }
  func.func @transform_0(%arg0: i32) -> (i32, i32, i32) {
    %c0_i32 = arith.constant 0 : i32
    %c0_i32_0 = arith.constant 0 : i32
    %c0_i32_1 = arith.constant 0 : i32
    return %arg0, %c0_i32, %c0_i32_0 : i32, i32, i32
  }
  func.func @transform_1(%arg0: i32) -> (i32, i32) {
    %c0_i32 = arith.constant 0 : i32
    %c0_i32_0 = arith.constant 0 : i32
    %c0_i32_1 = arith.constant 0 : i32
    return %c0_i32, %c0_i32_0 : i32, i32
  }
  func.func @transform_2(%arg0: i32) -> (i32, i32) {
    %c0_i32 = arith.constant 0 : i32
    %c0_i32_0 = arith.constant 0 : i32
    %c0_i32_1 = arith.constant 0 : i32
    return %c0_i32, %c0_i32_0 : i32, i32
  }
  func.func @transform_3(%arg0: i32) -> (i32, i32, i32) {
    %c0_i32 = arith.constant 0 : i32
    %c0_i32_0 = arith.constant 0 : i32
    %c0_i32_1 = arith.constant 0 : i32
    return %arg0, %c0_i32, %c0_i32_0 : i32, i32, i32
  }
}

</mosaic_0001>

<bundles_post_ra>
// kernel: sa_forward.1
= control target key start
LH: loop header
LB: loop body
LE: loop exit
PB: predicated region body
PF: predicated region fallthrough
CT: control target
= control target key end

     0   :  { %s859_s12 = smov 0   ;;  %s1042_s0 = inlined_call_operand.vmem [shape: f32[2,64,256], index: 0, kind: input, shape index: {}]   ;;  %s1043_s1 = inlined_call_operand.vmem [shape: f32[4,64], index: 1, kind: input, shape index: {}]   ;;  %s1044_s2 = inlined_call_operand.vmem [shape: f32[64,4], index: 2, kind: input, shape index: {}]   ;;  %s1045_s3 = inlined_call_operand.vmem [shape: f32[2,64,256], index: 3, kind: output, shape index: {}]  }
   0x1 LB: > { %s685_s13 = sadd.s32 4294967295, %s832_s12   ;;  %p689_p0 = scmp.ge.s32.totalorder %s832_s12, 1  ;;  %s832_s12 = sphi %s859_s12, %s13_s12  }
   0x2   : > { %p137_p1 = scmp.lt.s32.totalorder %s832_s12, 3 }
   0x4   : > { %p138_p2 = pnand %p689_p0, %p137_p1 }
   0x5   : > { %p161_p3 = scmp.lt.s32.totalorder (!%p138_p2), %s685_s13, 1  ;;  %v834_v30 = vmov (!%p138_p2), 0.0|0.0   ;;  %vm835_vm0 = vmmov (!%p138_p2), 0   ;;  %v836_v33 = vmov (!%p138_p2), 0.0   ;;  %vm243_vm1 = vcmask (!%p138_p2), 7168   ;;  %s837_s9 = smov (!%p138_p2), 127  }
   0x6   : > { %141 = sbr.rel (%p138_p2) target bundleno = 914 (0x392), region = 32  ;;  %767 = vmatprep.subr.bf16.mxu0 (!%p138_p2), %v834_v30  ;;  %750 = vmatprep.mubr.msk.f32.mxu0 (!%p138_p2), %vm835_vm0, %v836_v33  ;;  %vm261_vm2 = vcmask (!%p138_p2), 523264   ;;  %vm336_vm3 = vcmask (!%p138_p2), 31744   ;;  %vm361_vm4 = vcmask (!%p138_p2), 1043456   ;;  %v260_v33 = vld [vmem:[%s1044_s2 + $0x38] sm:$0xff] (!%p138_p2) }
   0xd   : > { %s1047_s13 = smov (!%p161_p3, %s685_s13), 1 }
   0xe   : > { %s714_s14 = sshll.u32 %s1047_s13, 7 }
   0xf   : > { %s875_s17 = scalar_lea.vmem %s1042_s0, %s714_s14  ;;  %s1005_s15 = scalar_lea.vmem %s1045_s3, %s714_s14 }
  0x10   : > { %v878_v0 = vld [vmem:[%s875_s17] sm:$0xff]  ;;  %v881_v1 = vld [vmem:[%s875_s17 + $0x8] sm:$0xff]  ;;  %v884_v2 = vld [vmem:[%s875_s17 + $0x10] sm:$0xff] }
  0x11   : > { %v219_v3 = vmax.f32 %v878_v0, %v881_v1  ;;  %v187_v4 = vadd.f32 %v881_v1, %v878_v0  ;;  %v891_v5 = vld [vmem:[%s875_s17 + $0x18] sm:$0xff]  ;;  %v898_v8 = vld [vmem:[%s875_s17 + $0x30] sm:$0xff]  ;;  %v904_v10 = vld [vmem:[%s875_s17 + $0x20] sm:$0xff] }
  0x12   : > { %v222_v6 = vmax.f32 %v884_v2, %v891_v5  ;;  %v190_v7 = vadd.f32 %v891_v5, %v884_v2  ;;  %v901_v9 = vld [vmem:[%s875_s17 + $0x38] sm:$0xff]  ;;  %v907_v11 = vld [vmem:[%s875_s17 + $0x28] sm:$0xff]  ;;  %v918_v16 = vld [vmem:[%s875_s17 + $0x50] sm:$0xff] }
  0x13   : > { %220 = vmax.xlane.f32.xlu1 %v219_v3  ;;  %188 = vadd.xlane.f32.xlu0 %v187_v4  ;;  %v196_v12 = vadd.f32 %v901_v9, %v898_v8  ;;  %v193_v13 = vadd.f32 %v907_v11, %v904_v10  ;;  %v228_v14 = vmax.f32 %v898_v8, %v901_v9  ;;  %v921_v17 = vld [vmem:[%s875_s17 + $0x58] sm:$0xff]  ;;  %v924_v18 = vld [vmem:[%s875_s17 + $0x40] sm:$0xff]  ;;  %v927_v19 = vld [vmem:[%s875_s17 + $0x48] sm:$0xff] }
  0x14   : > { %v225_v15 = vmax.f32 %v904_v10, %v907_v11  ;;  %v202_v20 = vadd.f32 %v921_v17, %v918_v16  ;;  %v199_v21 = vadd.f32 %v927_v19, %v924_v18  ;;  %v234_v22 = vmax.f32 %v918_v16, %v921_v17  ;;  %v938_v24 = vld [vmem:[%s875_s17 + $0x70] sm:$0xff]  ;;  %v941_v25 = vld [vmem:[%s875_s17 + $0x78] sm:$0xff]  ;;  %v944_v26 = vld [vmem:[%s875_s17 + $0x60] sm:$0xff] }
  0x15   : > { %v231_v23 = vmax.f32 %v924_v18, %v927_v19  ;;  %v947_v27 = vld [vmem:[%s875_s17 + $0x68] sm:$0xff]  ;;  %v208_v28 = vadd.f32 %v941_v25, %v938_v24  ;;  %v240_v31 = vmax.f32 %v938_v24, %v941_v25 }
  0x16   : > { %v205_v29 = vadd.f32 %v947_v27, %v944_v26  ;;  %v237_v32 = vmax.f32 %v944_v26, %v947_v27 }
  0x17   : > { %223 = vmax.xlane.f32.xlu1 %v222_v6  ;;  %191 = vadd.xlane.f32.xlu0 %v190_v7 }
  0x1b   : > { %197 = vadd.xlane.f32.xlu1 %v196_v12  ;;  %194 = vadd.xlane.f32.xlu0 %v193_v13 }
  0x1f   : > { %229 = vmax.xlane.f32.xlu1 %v228_v14  ;;  %226 = vmax.xlane.f32.xlu0 %v225_v15  ;;  %v252_v14 = vld [vmem:[%s1043_s1] sm:$0xf] }
  0x20   : > { %v253_v15 = vld [vmem:[%s1044_s2] sm:$0xff] }
  0x21   : > { %755 = vmatprep.mubr.msk.f32.mxu1 %vm336_vm3, %v253_v15 }
  0x23   : > { %203 = vadd.xlane.f32.xlu1 %v202_v20  ;;  %200 = vadd.xlane.f32.xlu0 %v199_v21 }
  0x27   : > { %235 = vmax.xlane.f32.xlu1 %v234_v22  ;;  %232 = vmax.xlane.f32.xlu0 %v231_v23  ;;  %v254_v23 = vld [vmem:[%s1044_s2 + $0x8] sm:$0xff] }
  0x2b   : > { %209 = vadd.xlane.f32.xlu1 %v208_v28  ;;  %206 = vadd.xlane.f32.xlu0 %v205_v29  ;;  %v255_v28 = vld [vmem:[%s1044_s2 + $0x10] sm:$0xff]  ;;  %v256_v29 = vld [vmem:[%s1044_s2 + $0x18] sm:$0xff] }
  0x2f   : > { %241 = vmax.xlane.f32.xlu1 %v240_v31  ;;  %238 = vmax.xlane.f32.xlu0 %v237_v32  ;;  %v258_v31 = vld [vmem:[%s1044_s2 + $0x28] sm:$0xff]  ;;  %v259_v32 = vld [vmem:[%s1044_s2 + $0x30] sm:$0xff] }
  0xa0   : > { %v221_v34 = vpop.xlane.xlu1 %220  ;;  %v189_v35 = vpop.xlane.xlu0 %188 }
  0xa1   : > { %v211_v36 = vmul.f32 0.00390625, %v189_v35 }
  0xa3   : > { %v244_v40 = vsel %vm243_vm1, %v211_v36, %v221_v34 }
  0xa4   : > { %v224_v37 = vpop.xlane.xlu1 %223  ;;  %v192_v38 = vpop.xlane.xlu0 %191 }
  0xa5   : > { %v212_v39 = vmul.f32 0.00390625, %v192_v38 }
  0xa7   : > { %v245_v41 = vsel %vm243_vm1, %v212_v39, %v224_v37 }
  0xa8   : > { %v198_v42 = vpop.xlane.xlu1 %197  ;;  %v195_v43 = vpop.xlane.xlu0 %194  ;;  %v768_v44 = vpack.c.bf16 %v245_v41, %v244_v40 }
  0xa9   : > { %v214_v45 = vmul.f32 0.00390625, %v198_v42  ;;  %v213_v46 = vmul.f32 0.00390625, %v195_v43  ;;  %v838_v42 = vmov 0  }
  0xaa   : > { %769 = vmatpush3.bf16.msra.mxu0 %v768_v44  ;;  %793 = vset.pattern.permute.xlu0 %v838_v42 }
  0xab   : > { %770 = vmatprep.subr.bf16.mxu0 %v834_v30  ;;  %792 = vset.pattern.permute.xlu1 %v838_v42 }
  0xac   : > { %v230_v47 = vpop.xlane.xlu1 %229  ;;  %v227_v48 = vpop.xlane.xlu0 %226 }
  0xad   : > { %v247_v49 = vsel %vm243_vm1, %v214_v45, %v230_v47  ;;  %v246_v50 = vsel %vm243_vm1, %v213_v46, %v227_v48 }
  0xae   : > { %v771_v51 = vpack.c.bf16 %v247_v49, %v246_v50 }
  0xb0   : > { %v204_v52 = vpop.xlane.xlu1 %203  ;;  %772 = vmatpush3.bf16.msra.mxu0 %v771_v51  ;;  %v201_v53 = vpop.xlane.xlu0 %200 }
  0xb1   : > { %773 = vmatprep.subr.bf16.mxu0 %v834_v30  ;;  %v216_v54 = vmul.f32 0.00390625, %v204_v52  ;;  %v215_v55 = vmul.f32 0.00390625, %v201_v53 }
  0xb4   : > { %v236_v56 = vpop.xlane.xlu1 %235  ;;  %v233_v57 = vpop.xlane.xlu0 %232 }
  0xb5   : > { %v249_v58 = vsel %vm243_vm1, %v216_v54, %v236_v56  ;;  %v248_v59 = vsel %vm243_vm1, %v215_v55, %v233_v57 }
  0xb6   : > { %v774_v60 = vpack.c.bf16 %v249_v58, %v248_v59 }
  0xb8   : > { %v210_v61 = vpop.xlane.xlu1 %209  ;;  %775 = vmatpush3.bf16.msra.mxu0 %v774_v60  ;;  %v207_v62 = vpop.xlane.xlu0 %206 }
  0xb9   : > { %776 = vmatprep.subr.bf16.mxu0 %v834_v30  ;;  %v218_v63 = vmul.f32 0.00390625, %v210_v61  ;;  %v217_v3 = vmul.f32 0.00390625, %v207_v62  ;;  %v257_v30 = vld [vmem:[%s1044_s2 + $0x20] sm:$0xff] }
  0xbc   : > { %v242_v4 = vpop.xlane.xlu1 %241  ;;  %v239_v6 = vpop.xlane.xlu0 %238 }
  0xbd   : > { %v251_v7 = vsel %vm243_vm1, %v218_v63, %v242_v4  ;;  %v250_v12 = vsel %vm243_vm1, %v217_v3, %v239_v6 }
  0xbe   : > { %v777_v13 = vpack.c.bf16 %v251_v7, %v250_v12 }
  0xc0   : > { %778 = vmatpush3.bf16.msra.mxu0 %v777_v13 }
  0xc3   : > { %751 = vmatmul.mubr.msk.f32.vlgmr.msra.gmra.mrb[0].mxu0 %vm261_vm2, %v252_v14 }
 0x196   : > { %v331_v20 = vpop.f32.mrb[0].mxu0 }
 0x197   : > { %v335_v21 = vmax.f32 %v331_v20, 0.0  ;;  %v752_v22 = vpop.f32.mrb[1].mxu0 }
 0x199   : > { %753 = vmatprep.subr.msk.mxu1 %vm361_vm4, %v335_v21 }
 0x19a   : > { %754 = vmatpush3.msk.msra.mxu1 %vm361_vm4, %v335_v21 }
 0x19b   : > { %756 = vmatmul.mubr.msk.f32.vlgmr.msra.gmra.mrb[0].mxu1 %vm336_vm3, %v254_v23 }
 0x19c   : > { %758 = vmatprep.mubr.msk.f32.mxu1 %vm336_vm3, %v255_v28 }
 0x19f   : > { %759 = vmatmul.mubr.msk.f32.gmra.mrb[2].mxu1 %vm336_vm3, %v256_v29 }
 0x1a0   : > { %761 = vmatprep.mubr.msk.f32.mxu1 %vm336_vm3, %v257_v30 }
 0x1a3   : > { %762 = vmatmul.mubr.msk.f32.gmra.mrb[4].mxu1 %vm336_vm3, %v258_v31 }
 0x1a4   : > { %764 = vmatprep.mubr.msk.f32.mxu1 %vm336_vm3, %v259_v32 }
 0x1a7   : > { %765 = vmatmul.mubr.msk.f32.gmra.mrb[6].mxu1 %vm336_vm3, %v260_v33 }
 0x26e   : > { %v757_v34 = vpop.f32.mrb[0].mxu1 }
 0x26f   : > { %480 = vrot.lane.b32.xlu1 %v757_v34, %s837_s9  ;;  %v431_v35 = vpop.f32.mrb[1].mxu1 }
 0x270   : > { %478 = vrot.lane.b32.xlu0 %v431_v35, %s837_s9 }
 0x272   : > { %v760_v36 = vpop.f32.mrb[2].mxu1 }
 0x273   : > { %484 = vrot.lane.b32.xlu1 %v760_v36, %s837_s9  ;;  %v441_v37 = vpop.f32.mrb[3].mxu1 }
 0x276   : > { %v763_v38 = vpop.f32.mrb[4].mxu1 }
 0x277   : > { %482 = vrot.lane.b32.xlu1 %v441_v37, %s837_s9  ;;  %v451_v39 = vpop.f32.mrb[5].mxu1 }
 0x278   : > { %486 = vrot.lane.b32.xlu0 %v451_v39, %s837_s9 }
 0x27a   : > { %v766_v40 = vpop.f32.mrb[6].mxu1 }
 0x27b   : > { %488 = vrot.lane.b32.xlu1 %v763_v38, %s837_s9  ;;  %v461_v41 = vpop.f32.mrb[7].mxu1 }
 0x27c   : > { %490 = vrot.lane.b32.xlu0 %v461_v41, %s837_s9 }
 0x27f   : > { %492 = vrot.lane.b32.xlu1 %v766_v40, %s837_s9 }
 0x2e1   : > { %v481_v43 = vpop.permute.xlu1 %480 }
 0x2e2   : > { %v503_v44 = vadd.f32 %v757_v34, %v481_v43  ;;  %v479_v45 = vpop.permute.xlu0 %478 }
 0x2e3   : > { %v502_v46 = vadd.f32 %v479_v45, %v431_v35 }
 0x2e4   : > { %v705_v47 = vmul.f32 -1.442695, %v503_v44 }
 0x2e5   : > { %v704_v48 = vmul.f32 -1.442695, %v502_v46  ;;  %v485_v49 = vpop.permute.xlu1 %484 }
 0x2e6   : > { %794 = vpow2.f32 %v705_v47  ;;  %v505_v50 = vadd.f32 %v760_v36, %v485_v49 }
 0x2e7   : > { %796 = vpow2.f32 %v704_v48 }
 0x2e8   : > { %v707_v51 = vmul.f32 -1.442695, %v505_v50 }
 0x2e9   : > { %v483_v52 = vpop.permute.xlu1 %482 }
 0x2ea   : > { %798 = vpow2.f32 %v707_v51  ;;  %v504_v53 = vadd.f32 %v483_v52, %v441_v37  ;;  %v487_v54 = vpop.permute.xlu0 %486 }
 0x2eb   : > { %v506_v55 = vadd.f32 %v487_v54, %v451_v39 }
 0x2ec   : > { %v706_v56 = vmul.f32 -1.442695, %v504_v53 }
 0x2ed   : > { %v708_v57 = vmul.f32 -1.442695, %v506_v55  ;;  %v489_v58 = vpop.permute.xlu1 %488 }
 0x2ee   : > { %800 = vpow2.f32 %v706_v56  ;;  %v507_v59 = vadd.f32 %v763_v38, %v489_v58  ;;  %v491_v60 = vpop.permute.xlu0 %490 }
 0x2ef   : > { %802 = vpow2.f32 %v708_v57  ;;  %v508_v61 = vadd.f32 %v491_v60, %v461_v41 }
 0x2f0   : > { %v795_v62 = vpop.eup %794  ;;  %v709_v63 = vmul.f32 -1.442695, %v507_v59 }
 0x2f1   : > { %v797_v3 = vpop.eup %796  ;;  %v535_v4 = vadd.f32 1.0, %v795_v62  ;;  %v710_v6 = vmul.f32 -1.442695, %v508_v61  ;;  %v493_v7 = vpop.permute.xlu1 %492 }
 0x2f2   : > { %v534_v12 = vadd.f32 1.0, %v797_v3  ;;  %804 = vpow2.f32 %v709_v63  ;;  %v509_v13 = vadd.f32 %v766_v40, %v493_v7 }
 0x2f3   : > { %806 = vrcp.f32 %v535_v4 }
 0x2f4   : > { %v799_v14 = vpop.eup %798  ;;  %808 = vrcp.f32 %v534_v12  ;;  %v711_v15 = vmul.f32 -1.442695, %v509_v13 }
 0x2f5   : > { %v537_v20 = vadd.f32 1.0, %v799_v14  ;;  %810 = vpow2.f32 %v710_v6 }
 0x2f6   : > { %812 = vpow2.f32 %v711_v15 }
 0x2f7   : > { %814 = vrcp.f32 %v537_v20 }
 0x2f8   : > { %v801_v21 = vpop.eup %800 }
 0x2f9   : > { %v803_v22 = vpop.eup %802  ;;  %v536_v23 = vadd.f32 1.0, %v801_v21 }
 0x2fa   : > { %v538_v28 = vadd.f32 1.0, %v803_v22 }
 0x2fb   : > { %816 = vrcp.f32 %v536_v23 }
 0x2fc   : > { %v805_v29 = vpop.eup %804  ;;  %818 = vrcp.f32 %v538_v28 }
 0x2fd   : > { %v807_v30 = vpop.eup %806  ;;  %v539_v31 = vadd.f32 1.0, %v805_v29 }
 0x2fe   : > { %v809_v32 = vpop.eup %808  ;;  %565 = vperm.xlu1 %792, %v807_v30  }
 0x2ff   : > { %v811_v33 = vpop.eup %810  ;;  %820 = vrcp.f32 %v539_v31  ;;  %560 = vperm.xlu0 %793, %v809_v32  }
 0x300   : > { %v813_v34 = vpop.eup %812  ;;  %v540_v35 = vadd.f32 1.0, %v811_v33 }
 0x301   : > { %v815_v36 = vpop.eup %814  ;;  %v541_v37 = vadd.f32 1.0, %v813_v34 }
 0x302   : > { %822 = vrcp.f32 %v540_v35 }
 0x303   : > { %824 = vrcp.f32 %v541_v37  ;;  %575 = vperm.xlu0 %793, %v815_v36  }
 0x305   : > { %v817_v38 = vpop.eup %816 }
 0x306   : > { %570 = vperm.xlu1 %792, %v817_v38   ;;  %v819_v39 = vpop.eup %818 }
 0x309   : > { %v821_v40 = vpop.eup %820 }
 0x30a   : > { %580 = vperm.xlu1 %792, %v819_v39   ;;  %585 = vperm.xlu0 %793, %v821_v40  }
 0x30c   : > { %v823_v41 = vpop.eup %822 }
 0x30d   : > { %v825_v42 = vpop.eup %824 }
 0x30e   : > { %595 = vperm.xlu0 %793, %v825_v42   ;;  %590 = vperm.xlu1 %792, %v823_v41  }
 0x37d   : > { %v566_v43 = vpop.permute.xlu1 %565 }
 0x37e   : > { %v600_v44 = vmul.f32 %v566_v43, %v884_v2  ;;  %v601_v45 = vmul.f32 %v566_v43, %v891_v5  ;;  %v561_v46 = vpop.permute.xlu0 %560 }
 0x37f   : > { %v598_v47 = vmul.f32 %v561_v46, %v878_v0  ;;  %v599_v48 = vmul.f32 %v561_v46, %v881_v1 }
 0x380   : > { %616 = vst [vmem:[%s1005_s15 + $0x10] sm:$0xff] %v600_v44  ;;  %617 = vst [vmem:[%s1005_s15 + $0x18] sm:$0xff] %v601_v45 }
 0x381   : > { %614 = vst [vmem:[%s1005_s15] sm:$0xff] %v598_v47  ;;  %615 = vst [vmem:[%s1005_s15 + $0x8] sm:$0xff] %v599_v48 }
 0x382   : > { %v576_v49 = vpop.permute.xlu0 %575 }
 0x383   : > { %v604_v50 = vmul.f32 %v576_v49, %v898_v8  ;;  %v605_v2 = vmul.f32 %v576_v49, %v901_v9 }
 0x385   : > { %620 = vst [vmem:[%s1005_s15 + $0x30] sm:$0xff] %v604_v50  ;;  %621 = vst [vmem:[%s1005_s15 + $0x38] sm:$0xff] %v605_v2  ;;  %v571_v5 = vpop.permute.xlu1 %570 }
 0x386   : > { %v602_v0 = vmul.f32 %v571_v5, %v904_v10  ;;  %v603_v1 = vmul.f32 %v571_v5, %v907_v11 }
 0x388   : > { %618 = vst [vmem:[%s1005_s15 + $0x20] sm:$0xff] %v602_v0  ;;  %619 = vst [vmem:[%s1005_s15 + $0x28] sm:$0xff] %v603_v1 }
 0x389   : > { %v581_v51 = vpop.permute.xlu1 %580  ;;  %v586_v52 = vpop.permute.xlu0 %585 }
 0x38a   : > { %v606_v8 = vmul.f32 %v581_v51, %v924_v18  ;;  %v607_v9 = vmul.f32 %v581_v51, %v927_v19  ;;  %v608_v53 = vmul.f32 %v586_v52, %v918_v16  ;;  %v609_v54 = vmul.f32 %v586_v52, %v921_v17 }
 0x38c   : > { %622 = vst [vmem:[%s1005_s15 + $0x40] sm:$0xff] %v606_v8  ;;  %623 = vst [vmem:[%s1005_s15 + $0x48] sm:$0xff] %v607_v9 }
 0x38d   : > { %624 = vst [vmem:[%s1005_s15 + $0x50] sm:$0xff] %v608_v53  ;;  %625 = vst [vmem:[%s1005_s15 + $0x58] sm:$0xff] %v609_v54  ;;  %v591_v10 = vpop.permute.xlu1 %590  ;;  %v596_v11 = vpop.permute.xlu0 %595 }
 0x38e   : > { %v610_v55 = vmul.f32 %v591_v10, %v944_v26  ;;  %v611_v56 = vmul.f32 %v591_v10, %v947_v27  ;;  %v612_v18 = vmul.f32 %v596_v11, %v938_v24  ;;  %v613_v57 = vmul.f32 %v596_v11, %v941_v25 }
 0x390   : > { %626 = vst [vmem:[%s1005_s15 + $0x60] sm:$0xff] %v610_v55  ;;  %627 = vst [vmem:[%s1005_s15 + $0x68] sm:$0xff] %v611_v56 }
 0x391   : > { %628 = vst [vmem:[%s1005_s15 + $0x70] sm:$0xff] %v612_v18  ;;  %629 = vst [vmem:[%s1005_s15 + $0x78] sm:$0xff] %v613_v57 }
 0x392 PF: > { %s13_s12 = sadd.s32 1, %s832_s12  }
 0x393   : > { %p10_p4 = scmp.ge.s32.totalorder %s13_s12, 4  }
 0x395   :  { %12 = sbr.rel (!%p10_p4) target bundleno = 1 (0x1), region = 62 }

</bundles_post_ra>
